<compile_context>
chip_gen: v7x
topology: tpu7x:2x2x1
jax: 0.10.0
libtpu: 0.0.40
codegen_flags: <defaults>
</compile_context>

<pallas_src>
import functools

import jax
import jax.numpy as jnp
from jax import lax
from jax.experimental import pallas as pl
from jax.experimental.pallas import tpu as pltpu


def _partial_gram_kernel(x_ref, out_ref, *, tk, nk_per, d_true, needs_mask):
    # x_ref:   (B, tk)  streamed feature chunk, native dtype (f32 or bf16), VMEM
    # out_ref: (B, B)   f32 partial Gram for this shard (block stays resident across
    #                   the inner reduction axis; written back once per shard)
    s = pl.program_id(0)   # shard (parallel axis)
    k = pl.program_id(1)   # chunk within shard (reduction axis)

    @pl.when(k == 0)
    def _init():
        out_ref[...] = jnp.zeros_like(out_ref)

    x = x_ref[...]  # keep native dtype: bf16 x bf16 -> f32 is native on the MXU
    if needs_mask:
        # Logical (pre-clamp) chunk index -> global column index; zero out any lane
        # past the true feature width D (covers the ragged tail block and any fully
        # out-of-range chunk whose DMA was clamped to re-read an in-bounds block).
        chunk = s * nk_per + k
        col = chunk * tk + lax.broadcasted_iota(jnp.int32, x.shape, 1)
        x = jnp.where(col < d_true, x, jnp.zeros_like(x))

    out_ref[...] += lax.dot_general(
        x, x,
        dimension_numbers=(((1,), (1,)), ((), ())),
        preferred_element_type=jnp.float32,
    )


def spacial_separation(outputs, labels, *, max_tk=None):
    """JAX/Pallas equivalent of SpacialSeparation.forward(outputs, labels)."""
    b = outputs.shape[0]
    x = outputs.reshape(b, -1)
    # Keep bf16 narrow in HBM; anything else goes to f32.
    if x.dtype not in (jnp.float32, jnp.bfloat16):
        x = x.astype(jnp.float32)
    d = x.shape[1]
    itemsize = jnp.dtype(x.dtype).itemsize

    # ---- generation-aware VMEM budget -> tile size -------------------------------
    try:
        vmem_cap = int(getattr(pltpu.get_tpu_info(), "vmem_capacity_bytes", 64 << 20))
    except Exception:  # pragma: no cover - conservative fallback (v7x per-TC VMEM)
        vmem_cap = 64 << 20
    # ~2 MiB per streamed x tile (near the measured HBM-roofline plateau), and never
    # more than ~25% of VMEM for the pair of double-buffered tiles.
    tile_bytes = min(2 << 20, vmem_cap // 8)
    tk = max(128, (tile_bytes // (b * itemsize)) // 128 * 128)
    if max_tk is not None:
        tk = min(tk, max(128, (max_tk // 128) * 128))

    if tk >= d:
        tk = d                      # single chunk: block == full array dim (legal, no mask)
        nk_total = 1
    else:
        nk_total = pl.cdiv(d, tk)   # ragged tail handled in-kernel, no jnp.pad copy

    # Shard the D reduction across TensorCores (2x on v7x; near-free elsewhere).
    ns = 2 if nk_total >= 2 else 1
    nk_per = pl.cdiv(nk_total, ns)
    needs_mask = (ns * nk_per * tk) != d
    last_chunk = nk_total - 1

    def x_index_map(sh, kk):
        chunk = sh * nk_per + kk
        if needs_mask:
            # Fully out-of-range chunks re-read the last in-bounds block; their
            # contribution is masked to zero inside the kernel.
            chunk = jnp.minimum(chunk, last_chunk)
        return (0, chunk)

    kernel = functools.partial(
        _partial_gram_kernel, tk=tk, nk_per=nk_per, d_true=d, needs_mask=needs_mask
    )

    vmem_needed = 2 * b * tk * itemsize + 2 * b * b * 4
    vmem_limit = int(min(max(2 * vmem_needed, 16 << 20), vmem_cap // 2))

    cost = pl.CostEstimate(
        flops=int(2 * b * b * d),                      # Gram matmul
        transcendentals=0,                             # epilogue is outside the kernel
        bytes_accessed=int(b * d * itemsize + ns * b * b * 4),
    )

    partial_grams = pl.pallas_call(
        kernel,
        out_shape=jax.ShapeDtypeStruct((ns, b, b), jnp.float32),
        grid_spec=pltpu.PrefetchScalarGridSpec(
            num_scalar_prefetch=0,
            grid=(ns, nk_per),
            in_specs=[
                pl.BlockSpec((b, tk), x_index_map),    # streamed, double-buffered
            ],
            out_specs=pl.BlockSpec((None, b, b), lambda sh, kk: (sh, 0, 0)),
        ),
        compiler_params=pltpu.CompilerParams(
            dimension_semantics=("parallel", "arbitrary"),
            vmem_limit_bytes=vmem_limit,
        ),
        cost_estimate=cost,
    )(x)

    # ---- tiny (B, B) epilogue in plain JAX ---------------------------------------
    gram = jnp.sum(partial_grams, axis=0)                          # (B, B) f32
    sqn = jnp.diagonal(gram)[:, None]                              # (B, 1) squared norms
    # ||x_i - x_j||^2 = |x_i|^2 + |x_j|^2 - 2 <x_i, x_j>   (clamped; f32 throughout)
    sq_dist = jnp.maximum(sqn + sqn.T - 2.0 * gram, 0.0)
    dist = jnp.sqrt(jnp.sqrt(sq_dist))                             # (sum sq)^0.25
    lab = labels.reshape(-1)
    sign = jnp.where(lab[:, None] != lab[None, :], 1.0, -1.0)
    mask = jnp.triu(jnp.ones((b, b), dtype=bool), k=1)             # strict upper triangle
    return jnp.sum(jnp.where(mask, dist * sign, 0.0))


if __name__ == "__main__":
    key = jax.random.PRNGKey(0)
    k_out, k_lab = jax.random.split(key)

    # Small shapes consistent with the module's forward: a batch of feature maps + labels.
    B, C, H, W = 8, 4, 16, 16                      # D = C*H*W = 1024
    outputs = jax.random.normal(k_out, (B, C, H, W), dtype=jnp.float32)
    labels = jax.random.randint(k_lab, (B,), 0, 3, dtype=jnp.int32)

    # Pure-JAX reference of the same semantics (direct-difference formulation).
    x = outputs.reshape(B, -1)
    diff = x[:, None, :] - x[None, :, :]
    sq = jnp.sum(diff * diff, axis=-1)
    dist_ref = jnp.sqrt(jnp.sqrt(jnp.maximum(sq, 0.0)))
    sign_ref = jnp.where(labels[:, None] != labels[None, :], 1.0, -1.0)
    mask_ref = jnp.triu(jnp.ones((B, B), dtype=bool), k=1)
    ref = jnp.sum(jnp.where(mask_ref, dist_ref * sign_ref, 0.0))

    # Default path: VMEM-budgeted tk (single chunk at this small demo size).
    r1 = spacial_separation(outputs, labels)
    jax.block_until_ready(r1)
    assert jnp.allclose(r1, ref, rtol=1e-4, atol=1e-3), (r1, ref)

    # Force the multi-chunk / dual-shard / ragged-tail masking path (tk=384 -> 3 chunks,
    # 2 shards, one clamped+masked out-of-range chunk).
    r2 = spacial_separation(outputs, labels, max_tk=384)
    jax.block_until_ready(r2)
    assert jnp.allclose(r2, ref, rtol=1e-4, atol=1e-3), (r2, ref)

    print("KERNEL_OK")
</pallas_src>

<mosaic_0001>
module attributes {stable_mosaic.version = 11 : i64} {
  func.func @_partial_gram_kernel(%arg0: i32, %arg1: i32, %arg2: memref<8x1024xf32, #tpu.memory_space<vmem>>, %arg3: memref<1x8x8xf32, #tpu.memory_space<vmem>>) attributes {dimension_semantics = [#tpu.dimension_semantics<parallel>, #tpu.dimension_semantics<arbitrary>], iteration_bounds = array<i64: 1, 1>, scalar_prefetch = 0 : i64, scratch_operands = 0 : i64, tpu.core_type = #tpu.core_type<tc>, window_params = [{transform_indices = @transform_0, window_bounds = array<i64: 8, 1024>}, {transform_indices = @transform_1, window_bounds = array<i64: 1, 8, 8>}]} {
    %c0_i32 = arith.constant 0 : i32
    %0 = arith.cmpi eq, %arg1, %c0_i32 : i32
    %1 = arith.extui %0 : i1 to i32
    %c0_i32_0 = arith.constant 0 : i32
    %2 = arith.cmpi ne, %1, %c0_i32_0 : i32
    scf.if %2 {
      %cst_8 = arith.constant 0.000000e+00 : f32
      %11 = vector.broadcast %cst_8 : f32 to vector<8x8xf32>
      %c0_9 = arith.constant 0 : index
      %c0_10 = arith.constant 0 : index
      %c0_11 = arith.constant 0 : index
      %12 = vector.load %arg3[%c0_9, %c0_10, %c0_11] : memref<1x8x8xf32, #tpu.memory_space<vmem>>, vector<1x8x8xf32>
      %13 = vector.shape_cast %12 : vector<1x8x8xf32> to vector<8x8xf32>
      %14 = vector.shape_cast %11 : vector<8x8xf32> to vector<1x8x8xf32>
      tpu.vector_store %arg3[%c0_9, %c0_10, %c0_11], %14 {strides = array<i32>} : memref<1x8x8xf32, #tpu.memory_space<vmem>>, vector<1x8x8xf32>,
    } else {
    }
    %c0 = arith.constant 0 : index
    %c0_1 = arith.constant 0 : index
    %3 = vector.load %arg2[%c0, %c0_1] : memref<8x1024xf32, #tpu.memory_space<vmem>>, vector<8x1024xf32>
    %c0_2 = arith.constant 0 : index
    %c0_3 = arith.constant 0 : index
    %c0_4 = arith.constant 0 : index
    %4 = vector.load %arg3[%c0_2, %c0_3, %c0_4] : memref<1x8x8xf32, #tpu.memory_space<vmem>>, vector<1x8x8xf32>
    %5 = vector.shape_cast %4 : vector<1x8x8xf32> to vector<8x8xf32>
    %cst = arith.constant dense<0.000000e+00> : vector<8x8xf32>
    %6 = tpu.matmul %3, %3, %cst {dimension_numbers = #tpu.dot_dimension_numbers<[1], [1], [0], [0], [0, 0, 1, 0], [], []>} : vector<8x1024xf32>, vector<8x1024xf32>, vector<8x8xf32> -> vector<8x8xf32>
    %7 = arith.addf %5, %6 : vector<8x8xf32>
    %c0_5 = arith.constant 0 : index
    %c0_6 = arith.constant 0 : index
    %c0_7 = arith.constant 0 : index
    %8 = vector.load %arg3[%c0_5, %c0_6, %c0_7] : memref<1x8x8xf32, #tpu.memory_space<vmem>>, vector<1x8x8xf32>
    %9 = vector.shape_cast %8 : vector<1x8x8xf32> to vector<8x8xf32>
    %10 = vector.shape_cast %7 : vector<8x8xf32> to vector<1x8x8xf32>
    tpu.vector_store %arg3[%c0_5, %c0_6, %c0_7], %10 {strides = array<i32>} : memref<1x8x8xf32, #tpu.memory_space<vmem>>, vector<1x8x8xf32>,
    return
  }
  func.func @transform_0(%arg0: i32, %arg1: i32) -> (i32, i32) {
    %c1_i32 = arith.constant 1 : i32
    %0 = arith.muli %arg0, %c1_i32 : i32
    %1 = arith.addi %0, %arg1 : i32
    %c0_i32 = arith.constant 0 : i32
    %c0_i32_0 = arith.constant 0 : i32
    return %c0_i32, %1 : i32, i32
  }
  func.func @transform_1(%arg0: i32, %arg1: i32) -> (i32, i32, i32) {
    %c0_i32 = arith.constant 0 : i32
    %c0_i32_0 = arith.constant 0 : i32
    %c0_i32_1 = arith.constant 0 : i32
    return %arg0, %c0_i32, %c0_i32_0 : i32, i32, i32
  }
}

</mosaic_0001>

<bundles_post_ra>
// kernel: tpu_custom_call.1
= control target key start
LH: loop header
LB: loop body
LE: loop exit
PB: predicated region body
PF: predicated region fallthrough
CT: control target
= control target key end

     0   :  { %6 = vsyncpa [#allocation3], 0  ;;  %s430_s0 = inlined_call_operand.hbm [shape: f32[8,1024], index: 0, kind: input, shape index: {}]   ;;  %s431_s1 = inlined_call_operand.hbm [shape: f32[1,8,8], index: 1, kind: output, shape index: {}]  }
   0x1   :  { %7 = vsyncpa [#allocation4], 0  ;;  %s391_s6 = smov [#allocation2]   ;;  %s343_s10 = scalar_lea.hbm %s430_s0, 1024 }
   0x2   :  { %s18_s7 = sshll.u32 %s391_s6, 4  ;;  %p344_p0 = scmp.ne.s32.totalorder %s430_s0, %s343_s10  ;;  %s19_s7 = int_to_ptr.vmem [resolvable:$true] %s18_s7 }
   0x3   :  { %p347_p1 = scmp.lt.u32.totalorder %s343_s10, %s430_s0 }
   0x5   :  { %p349_p2 = pnand %p347_p1, %p344_p0 }
   0x7   :  { %352 = shalt.err (!%p349_p2)
}
   0x8   :  { %s353_s15 = scalar_lea.vmem %s19_s7, 1024  ;;  %p358_p4 = scmp.lt.s32.totalorder %s19_s7, %s19_s7 }
   0x9   :  { %p354_p3 = scmp.ne.s32.totalorder %s19_s7, %s353_s15  ;;  %p359_p5 = scmp.lt.s32.totalorder %s353_s15, %s353_s15 }
   0xb   :  { %p360_p6 = por %p359_p5, %p358_p4 }
   0xd   :  { %p361_p7 = pnand %p360_p6, %p354_p3 }
   0xf   :  { %364 = shalt.err (!%p361_p7)
}
  0x10   :  { %21 = dma.hbm_to_vmem [thread:$0]  %s430_s0, 1024, %s19_s7, [#allocation3]  }
  0x11   :  { %387 = dma.done.wait [#allocation3], 1024  }
  0x12   :  { %388 = vsyncadd [#allocation3], 4294966272  ;;  %v34_v0 = vld [vmem:[#allocation2 + $0x8] sm:$0xff]  ;;  %v33_v1 = vld [vmem:[#allocation2] sm:$0xff]  ;;  %vm31_vm0 = vcmask 64512   ;;  %v392_v8 = vmov 0.0  }
  0x13   :  { %v36_v2 = vld [vmem:[#allocation2 + $0x18] sm:$0xff]  ;;  %42 = vmatprep.subr.mxu0 %v34_v0  ;;  %v35_v3 = vld [vmem:[#allocation2 + $0x10] sm:$0xff]  ;;  %v38_v4 = vld [vmem:[#allocation2 + $0x28] sm:$0xff]  ;;  %106 = vmatprep.mubr.f32.mxu0 %v34_v0  ;;  %32 = vst.msk [vmem:[#allocation5] sm:$0xff] %vm31_vm0, %v392_v8  ;;  %s393_s0 = smov [#allocation5]  }
  0x14   :  { %112 = vmatprep.subr.mxu1 %v36_v2  ;;  %43 = vmatpush1.xpose.msra.mxu0 %v33_v1  ;;  %v40_v5 = vld [vmem:[#allocation2 + $0x38] sm:$0xff]  ;;  %v37_v6 = vld [vmem:[#allocation2 + $0x20] sm:$0xff]  ;;  %v39_v7 = vld [vmem:[#allocation2 + $0x30] sm:$0xff]  ;;  %s331_s18 = sshll.u32 %s393_s0, 4  ;;  %s332_s18 = int_to_ptr.vmem [resolvable:$true] %s331_s18 }
  0x15   :  { %113 = vmatpush1.xpose.msra.mxu1 %v35_v3  ;;  %176 = vmatprep.mubr.f32.mxu1 %v36_v2  ;;  %s365_s19 = scalar_lea.vmem %s332_s18, 128  ;;  %p370_p9 = scmp.lt.s32.totalorder %s332_s18, %s332_s18 }
  0x16   :  { %182 = vmatprep.subr.mxu0 %v38_v4  ;;  %252 = vmatprep.subr.mxu1 %v40_v5  ;;  %p366_p8 = scmp.ne.s32.totalorder %s332_s18, %s365_s19  ;;  %p371_p10 = scmp.lt.s32.totalorder %s365_s19, %s365_s19 }
  0x17   :  { %107 = vmatmul.mubr.f32.vlgmr.msra.gmra.mrb[0].mxu0 %v33_v1 }
  0x18   :  { %177 = vmatmul.mubr.f32.vlgmr.msra.gmra.mrb[0].mxu1 %v35_v3  ;;  %183 = vmatpush1.xpose.msra.mxu0 %v37_v6  ;;  %p372_p11 = por %p371_p10, %p370_p9 }
  0x19   :  { %246 = vmatprep.mubr.f32.mxu0 %v38_v4  ;;  %253 = vmatpush1.xpose.msra.mxu1 %v39_v7 }
  0x1a   :  { %316 = vmatprep.mubr.f32.mxu1 %v40_v5  ;;  %v41_v18 = vld [vmem:[#allocation5] sm:$0xff]  ;;  %p373_p12 = pnand %p372_p11, %p366_p8 }
  0x1b   :  { %247 = vmatmul.mubr.f32.vlgmr.msra.gmra.mrb[2].mxu0 %v37_v6 }
  0x1c   :  { %317 = vmatmul.mubr.f32.vlgmr.msra.gmra.mrb[2].mxu1 %v39_v7 }
  0xea   :  { %v108_v9 = vpop.f32.mrb[0].mxu0 }
  0xeb   :  { %v178_v10 = vpop.f32.mrb[0].mxu1  ;;  %v110_v11 = vpop.f32.mrb[1].mxu0 }
  0xec   :  { %v179_v12 = vadd.f32 %v178_v10, %v108_v9  ;;  %v180_v13 = vpop.f32.mrb[1].mxu1 }
  0xee   :  { %v248_v14 = vpop.f32.mrb[2].mxu0 }
  0xef   :  { %v249_v15 = vadd.f32 %v248_v14, %v179_v12  ;;  %v250_v16 = vpop.f32.mrb[3].mxu0  ;;  %v318_v17 = vpop.f32.mrb[2].mxu1 }
  0xf0   :  { %v320_v19 = vpop.f32.mrb[3].mxu1 }
  0xf1   :  { %v319_v20 = vadd.f32 %v318_v17, %v249_v15 }
  0xf3   :  { %v322_v21 = vadd.f32 %v319_v20, %v41_v18 }
  0xf5   :  { %324 = vst.msk [vmem:[#allocation5] sm:$0xff] %vm31_vm0, %v322_v21 }
  0xf6   :  { %376 = shalt.err (!%p373_p12)
}
  0xf7   :  { %s377_s22 = scalar_lea.hbm %s431_s1, 128 }
  0xf8   :  { %p378_p13 = scmp.ne.s32.totalorder %s431_s1, %s377_s22  ;;  %p381_p0 = scmp.lt.u32.totalorder %s377_s22, %s431_s1 }
  0xfa   :  { %p383_p1 = pnand %p381_p0, %p378_p13 }
  0xfc   :  { %386 = shalt.err (!%p383_p1)
}
  0xfd   :  { %334 = dma.vmem_to_hbm [thread:$0]  %s332_s18, 128, %s431_s1, [#allocation4]  }
  0xfe   :  { %389 = dma.done.wait [#allocation4], 128  }
  0xff   :  { %390 = vsyncadd [#allocation4], 4294967168 }
 0x100   :  { %338 = vsyncpa [#allocation3], 1 }
 0x101   :  { %339 = vsyncpa [#allocation4], 1 }

</bundles_post_ra>
